<compile_context>
chip_gen: v6e
topology: v6e:2x2x1
jax: 0.10.0
libtpu: 0.0.40
codegen_flags: <defaults>
</compile_context>

<pallas_src>
import math

import jax
import jax.numpy as jnp
from jax import lax
from jax.experimental import pallas as pl
from jax.experimental.pallas import tpu as pltpu


_SQRT1_2 = 1.0 / math.sqrt(2.0)


def _gelu_exact(x):
    # PyTorch nn.GELU() default = exact (erf-based) GELU; computed in f32.
    return 0.5 * x * (1.0 + lax.erf(x * _SQRT1_2))


def _round_up(x, m):
    return (x + m - 1) // m * m


def _nbytes(shape, dtype):
    return int(math.prod(shape)) * jnp.dtype(dtype).itemsize


def _pick_col_tile(total_pad, want):
    """Largest multiple of 128 <= `want` that divides `total_pad` (>=128)."""
    want = max(128, min(want, total_pad))
    want = (want // 128) * 128
    for t in range(want, 127, -128):
        if total_pad % t == 0:
            return t
    return 128


def _vmem_capacity_bytes():
    # Generation-aware per-core VMEM (v5e/v6e: 128 MiB, v7x: 64 MiB).
    try:
        cap = int(pltpu.get_tpu_info().vmem_capacity_bytes)
        if cap > 0:
            return cap
    except Exception:  # hw-info query only; safe conservative fallback
        pass
    return 64 * 1024 * 1024


def _vmem_limit(footprint_bytes):
    cap = _vmem_capacity_bytes()
    hard_cap = max(cap - 8 * 1024 * 1024, 16 * 1024 * 1024)   # leave scratch headroom
    want = max(32 * 1024 * 1024, footprint_bytes + 8 * 1024 * 1024)
    return int(min(hard_cap, want))


# ---------------------------------------------------------------------------
# kernel 1: 3-layer MLP (x_proj) + L2-normalize of the raw input (x_n)
# grid = (batch tiles,)
# ---------------------------------------------------------------------------
def mlp_norm_kernel(x_ref, w1_ref, b1_ref, w2_ref, b2_ref, w3_ref, b3_ref,
                    proj_ref, xn_ref):
    x = x_ref[...]                                   # native dtype -> full MXU rate

    # ---- Linear -> GELU -> Linear -> GELU -> Linear (f32 accumulation) ----
    h = jnp.dot(x, w1_ref[...], preferred_element_type=jnp.float32)
    h = _gelu_exact(h + b1_ref[...].astype(jnp.float32))
    h = jnp.dot(h.astype(w2_ref.dtype), w2_ref[...],
                preferred_element_type=jnp.float32)
    h = _gelu_exact(h + b2_ref[...].astype(jnp.float32))
    p = jnp.dot(h.astype(w3_ref.dtype), w3_ref[...],
                preferred_element_type=jnp.float32)
    proj_ref[...] = (p + b3_ref[...].astype(jnp.float32)).astype(proj_ref.dtype)

    # ---- L2-normalize the ORIGINAL input (F.normalize, p=2, dim=-1) ----
    # x / clamp_min(||x||, 1e-12) == x * rsqrt(max(sum(x*x), 1e-24));
    # rsqrt lands on the EUP slot (free alongside the MXU).
    xf = x.astype(jnp.float32)
    sumsq = jnp.sum(xf * xf, axis=-1, keepdims=True)
    inv = lax.rsqrt(jnp.maximum(sumsq, 1e-24))
    xn_ref[...] = (xf * inv).astype(xn_ref.dtype)    # stored in x.dtype


# ---------------------------------------------------------------------------
# kernel 2: bias-free last layer  logits = x_n @ W_last
# grid = (out_dim tiles j  [OUTER, parallel], batch tiles i [inner])
# W_last's block index is constant along the inner axis -> each column tile is
# DMA'd from HBM exactly once and stays resident while all batch tiles stream.
# ---------------------------------------------------------------------------
def last_layer_kernel(xn_ref, wl_ref, logits_ref):
    logits_ref[...] = jnp.dot(
        xn_ref[...], wl_ref[...],
        preferred_element_type=jnp.float32).astype(logits_ref.dtype)


def dino_head(x, params, *, tile_b=512, tile_n=2048, out_dtype=None):
    """x: [B, in_dim]. params: dict of weights (see init_params).

    Returns (logits [B, out_dim], x_proj [B, bottleneck_dim]).
    Weights may be stored in bf16 to keep full MXU rate / halve HBM traffic;
    all matmuls accumulate in f32 (preferred_element_type).
    """
    B, in_dim = x.shape
    w1, b1 = params["w1"], params["b1"]
    w2, b2 = params["w2"], params["b2"]
    w3, b3 = params["w3"], params["b3"]
    wl = params["w_last"]
    hidden_dim = w1.shape[1]
    bottleneck_dim = w3.shape[1]
    out_dim = wl.shape[1]
    out_dtype = jnp.dtype(out_dtype if out_dtype is not None else x.dtype)

    # ---- batch tiling: sublane-aligned; ragged batch handled by zero-padding ----
    tb = max(8, min(_round_up(tile_b, 8), _round_up(B, 8)))
    B_pad = _round_up(B, tb)
    x_p = jnp.pad(x, ((0, B_pad - B), (0, 0))) if B_pad != B else x
    ni = B_pad // tb

    # ---- out_dim tiling: lane-dense 128-aligned tiles (pad + slice back) ----
    out_pad = _round_up(out_dim, 128)
    tn = _pick_col_tile(out_pad, tile_n)
    wl_p = jnp.pad(wl, ((0, 0), (0, out_pad - out_dim))) if out_pad != out_dim else wl
    nj = out_pad // tn

    # ================= kernel 1: MLP + normalize (grid over batch) =================
    vmem1 = (2 * _nbytes((tb, in_dim), x.dtype)                       # x tiles
             + 2 * (_nbytes((in_dim, hidden_dim), w1.dtype)
                    + _nbytes((hidden_dim, hidden_dim), w2.dtype)
                    + _nbytes((hidden_dim, bottleneck_dim), w3.dtype)
                    + _nbytes((1, hidden_dim), b1.dtype)
                    + _nbytes((1, hidden_dim), b2.dtype)
                    + _nbytes((1, bottleneck_dim), b3.dtype))
             + 2 * _nbytes((tb, bottleneck_dim), out_dtype)           # proj tiles
             + 2 * _nbytes((tb, in_dim), x.dtype)                     # x_n tiles
             + 2 * _nbytes((tb, hidden_dim), jnp.float32))            # f32 temporaries
    mlp_flops = 2 * B_pad * (in_dim * hidden_dim + hidden_dim * hidden_dim
                             + hidden_dim * bottleneck_dim)
    mlp_bytes = (2 * _nbytes((B_pad, in_dim), x.dtype)                # x read + x_n write
                 + _nbytes((B_pad, bottleneck_dim), out_dtype)
                 + sum(_nbytes(a.shape, a.dtype)
                       for a in (w1, b1, w2, b2, w3, b3)))

    proj, x_n = pl.pallas_call(
        mlp_norm_kernel,
        out_shape=(
            jax.ShapeDtypeStruct((B_pad, bottleneck_dim), out_dtype),  # x_proj
            jax.ShapeDtypeStruct((B_pad, in_dim), x.dtype),            # x_n
        ),
        grid_spec=pltpu.PrefetchScalarGridSpec(
            num_scalar_prefetch=0,
            grid=(ni,),
            in_specs=[
                pl.BlockSpec((tb, in_dim), lambda i: (i, 0)),             # x
                pl.BlockSpec((in_dim, hidden_dim), lambda i: (0, 0)),     # w1
                pl.BlockSpec((1, hidden_dim), lambda i: (0, 0)),          # b1
                pl.BlockSpec((hidden_dim, hidden_dim), lambda i: (0, 0)), # w2
                pl.BlockSpec((1, hidden_dim), lambda i: (0, 0)),          # b2
                pl.BlockSpec((hidden_dim, bottleneck_dim), lambda i: (0, 0)),  # w3
                pl.BlockSpec((1, bottleneck_dim), lambda i: (0, 0)),      # b3
            ],
            out_specs=[
                pl.BlockSpec((tb, bottleneck_dim), lambda i: (i, 0)),     # x_proj
                pl.BlockSpec((tb, in_dim), lambda i: (i, 0)),             # x_n
            ],
        ),
        compiler_params=pltpu.CompilerParams(
            dimension_semantics=("parallel",),
            vmem_limit_bytes=_vmem_limit(vmem1)),
        cost_estimate=pl.CostEstimate(
            flops=int(mlp_flops),
            transcendentals=int(2 * B_pad * hidden_dim),   # two erf-GELUs
            bytes_accessed=int(mlp_bytes)),
    )(x_p, w1, b1, w2, b2, w3, b3)

    # ============ kernel 2: last layer (out_dim outer, batch inner) ============
    vmem2 = (2 * _nbytes((tb, in_dim), x.dtype)          # x_n tiles (streamed)
             + 2 * _nbytes((in_dim, tn), wl.dtype)       # W_last tiles (resident per j)
             + 2 * _nbytes((tb, tn), out_dtype)          # logits tiles
             + _nbytes((tb, tn), jnp.float32))           # f32 accumulator before cast
    last_flops = 2 * B_pad * in_dim * out_pad
    last_bytes = (nj * _nbytes((B_pad, in_dim), x.dtype)     # x_n re-read per out tile
                  + _nbytes((in_dim, out_pad), wl.dtype)     # W_last read exactly once
                  + _nbytes((B_pad, out_pad), out_dtype))

    logits = pl.pallas_call(
        last_layer_kernel,
        out_shape=jax.ShapeDtypeStruct((B_pad, out_pad), out_dtype),
        grid_spec=pltpu.PrefetchScalarGridSpec(
            num_scalar_prefetch=0,
            grid=(nj, ni),                                   # out_dim OUTER, batch INNER
            in_specs=[
                pl.BlockSpec((tb, in_dim), lambda j, i: (i, 0)),   # x_n streams over i
                pl.BlockSpec((in_dim, tn), lambda j, i: (0, j)),   # W_last tile resident
            ],
            out_specs=pl.BlockSpec((tb, tn), lambda j, i: (i, j)),
        ),
        compiler_params=pltpu.CompilerParams(
            # out_dim tiles are independent -> core-shardable on v7x megacore.
            dimension_semantics=("parallel", "arbitrary"),
            vmem_limit_bytes=_vmem_limit(vmem2)),
        cost_estimate=pl.CostEstimate(
            flops=int(last_flops),
            transcendentals=0,
            bytes_accessed=int(last_bytes)),
    )(x_n, wl_p)

    return logits[:B, :out_dim], proj[:B]


def init_params(key, in_dim, out_dim, hidden_dim, bottleneck_dim,
                dtype=jnp.float32):
    """trunc_normal(std=0.02) weights, zero biases (DINOHead._init_weights)."""
    k1, k2, k3, kl = jax.random.split(key, 4)

    def tn(k, shape):
        # trunc_normal_(std=0.02, a=-2, b=2): bounds are +/-100 sigma, i.e.
        # effectively a plain normal * 0.02.
        return (0.02 * jax.random.normal(k, shape)).astype(dtype)

    return {
        "w1": tn(k1, (in_dim, hidden_dim)),
        "b1": jnp.zeros((1, hidden_dim), dtype),
        "w2": tn(k2, (hidden_dim, hidden_dim)),
        "b2": jnp.zeros((1, hidden_dim), dtype),
        "w3": tn(k3, (hidden_dim, bottleneck_dim)),
        "b3": jnp.zeros((1, bottleneck_dim), dtype),
        # last_layer = Linear(in_dim, out_dim, bias=False).
        "w_last": tn(kl, (in_dim, out_dim)),
    }


def dino_head_ref(x, p):
    """Pure-JAX reference for correctness checking."""
    f32 = lambda a: a.astype(jnp.float32)
    h = jax.nn.gelu(x @ f32(p["w1"]) + f32(p["b1"]), approximate=False)
    h = jax.nn.gelu(h @ f32(p["w2"]) + f32(p["b2"]), approximate=False)
    proj = h @ f32(p["w3"]) + f32(p["b3"])
    norm = jnp.sqrt(jnp.sum(x * x, axis=-1, keepdims=True))
    x_n = x / jnp.maximum(norm, 1e-12)
    logits = x_n @ f32(p["w_last"])
    return logits, proj


if __name__ == "__main__":
    # Small shapes consistent with the module (scaled-down DINOHead), chosen to
    # exercise ragged batch padding, out_dim padding (200 -> 256) and multi-tile
    # grids on both pallas_calls.  Production defaults: tile_b=512, tile_n=2048.
    B, in_dim, hidden_dim, bottleneck_dim, out_dim = 40, 64, 128, 64, 200

    key = jax.random.PRNGKey(0)
    kx, kp = jax.random.split(key)
    x = jax.random.normal(kx, (B, in_dim), dtype=jnp.float32)
    params = init_params(kp, in_dim, out_dim, hidden_dim, bottleneck_dim)

    logits, x_proj = dino_head(x, params, tile_b=16, tile_n=128)
    jax.block_until_ready((logits, x_proj))

    ref_logits, ref_proj = dino_head_ref(x, params)
    assert logits.shape == (B, out_dim) and x_proj.shape == (B, bottleneck_dim)
    assert jnp.allclose(logits, ref_logits, atol=1e-4, rtol=1e-4), (
        float(jnp.max(jnp.abs(logits - ref_logits))))
    assert jnp.allclose(x_proj, ref_proj, atol=1e-4, rtol=1e-4), (
        float(jnp.max(jnp.abs(x_proj - ref_proj))))

    print("KERNEL_OK")
</pallas_src>

<mosaic_0001>
module attributes {stable_mosaic.version = 11 : i64} {
  func.func @mlp_norm_kernel(%arg0: i32, %arg1: memref<16x64xf32, #tpu.memory_space<vmem>>, %arg2: memref<64x128xf32, #tpu.memory_space<vmem>>, %arg3: memref<1x128xf32, #tpu.memory_space<vmem>>, %arg4: memref<128x128xf32, #tpu.memory_space<vmem>>, %arg5: memref<1x128xf32, #tpu.memory_space<vmem>>, %arg6: memref<128x64xf32, #tpu.memory_space<vmem>>, %arg7: memref<1x64xf32, #tpu.memory_space<vmem>>, %arg8: memref<16x64xf32, #tpu.memory_space<vmem>>, %arg9: memref<16x64xf32, #tpu.memory_space<vmem>>) attributes {dimension_semantics = [#tpu.dimension_semantics<parallel>], iteration_bounds = array<i64: 3>, scalar_prefetch = 0 : i64, scratch_operands = 0 : i64, tpu.core_type = #tpu.core_type<tc>, window_params = [{transform_indices = @transform_0, window_bounds = array<i64: 16, 64>}, {pipeline_mode = #tpu.pipeline_mode<synchronous>, transform_indices = @transform_1, window_bounds = array<i64: 64, 128>}, {pipeline_mode = #tpu.pipeline_mode<synchronous>, transform_indices = @transform_2, window_bounds = array<i64: 1, 128>}, {pipeline_mode = #tpu.pipeline_mode<synchronous>, transform_indices = @transform_3, window_bounds = array<i64: 128, 128>}, {pipeline_mode = #tpu.pipeline_mode<synchronous>, transform_indices = @transform_4, window_bounds = array<i64: 1, 128>}, {pipeline_mode = #tpu.pipeline_mode<synchronous>, transform_indices = @transform_5, window_bounds = array<i64: 128, 64>}, {pipeline_mode = #tpu.pipeline_mode<synchronous>, transform_indices = @transform_6, window_bounds = array<i64: 1, 64>}, {transform_indices = @transform_7, window_bounds = array<i64: 16, 64>}, {transform_indices = @transform_8, window_bounds = array<i64: 16, 64>}]} {
    %c0 = arith.constant 0 : index
    %c0_0 = arith.constant 0 : index
    %0 = vector.load %arg1[%c0, %c0_0] : memref<16x64xf32, #tpu.memory_space<vmem>>, vector<16x64xf32>
    %c0_1 = arith.constant 0 : index
    %c0_2 = arith.constant 0 : index
    %1 = vector.load %arg2[%c0_1, %c0_2] : memref<64x128xf32, #tpu.memory_space<vmem>>, vector<64x128xf32>
    %cst = arith.constant dense<0.000000e+00> : vector<16x128xf32>
    %2 = tpu.matmul %0, %1, %cst {dimension_numbers = #tpu.dot_dimension_numbers<[1], [0], [0], [1], [0, 0, 1, 1], [], []>} : vector<16x64xf32>, vector<64x128xf32>, vector<16x128xf32> -> vector<16x128xf32>
    %c0_3 = arith.constant 0 : index
    %c0_4 = arith.constant 0 : index
    %3 = vector.load %arg3[%c0_3, %c0_4] : memref<1x128xf32, #tpu.memory_space<vmem>>, vector<1x128xf32>
    %4 = vector.broadcast %3 : vector<1x128xf32> to vector<16x128xf32>
    %5 = arith.addf %2, %4 : vector<16x128xf32>
    %cst_5 = arith.constant 5.000000e-01 : f32
    %6 = vector.broadcast %cst_5 : f32 to vector<16x128xf32>
    %7 = arith.mulf %6, %5 : vector<16x128xf32>
    %cst_6 = arith.constant 0.707106769 : f32
    %8 = vector.broadcast %cst_6 : f32 to vector<16x128xf32>
    %9 = arith.mulf %5, %8 : vector<16x128xf32>
    %10 = math.erf %9 : vector<16x128xf32>
    %cst_7 = arith.constant 1.000000e+00 : f32
    %11 = vector.broadcast %cst_7 : f32 to vector<16x128xf32>
    %12 = arith.addf %11, %10 : vector<16x128xf32>
    %13 = arith.mulf %7, %12 : vector<16x128xf32>
    %c0_8 = arith.constant 0 : index
    %c0_9 = arith.constant 0 : index
    %14 = vector.load %arg4[%c0_8, %c0_9] : memref<128x128xf32, #tpu.memory_space<vmem>>, vector<128x128xf32>
    %cst_10 = arith.constant dense<0.000000e+00> : vector<16x128xf32>
    %15 = tpu.matmul %13, %14, %cst_10 {dimension_numbers = #tpu.dot_dimension_numbers<[1], [0], [0], [1], [0, 0, 1, 1], [], []>} : vector<16x128xf32>, vector<128x128xf32>, vector<16x128xf32> -> vector<16x128xf32>
    %c0_11 = arith.constant 0 : index
    %c0_12 = arith.constant 0 : index
    %16 = vector.load %arg5[%c0_11, %c0_12] : memref<1x128xf32, #tpu.memory_space<vmem>>, vector<1x128xf32>
    %17 = vector.broadcast %16 : vector<1x128xf32> to vector<16x128xf32>
    %18 = arith.addf %15, %17 : vector<16x128xf32>
    %cst_13 = arith.constant 5.000000e-01 : f32
    %19 = vector.broadcast %cst_13 : f32 to vector<16x128xf32>
    %20 = arith.mulf %19, %18 : vector<16x128xf32>
    %cst_14 = arith.constant 0.707106769 : f32
    %21 = vector.broadcast %cst_14 : f32 to vector<16x128xf32>
    %22 = arith.mulf %18, %21 : vector<16x128xf32>
    %23 = math.erf %22 : vector<16x128xf32>
    %cst_15 = arith.constant 1.000000e+00 : f32
    %24 = vector.broadcast %cst_15 : f32 to vector<16x128xf32>
    %25 = arith.addf %24, %23 : vector<16x128xf32>
    %26 = arith.mulf %20, %25 : vector<16x128xf32>
    %c0_16 = arith.constant 0 : index
    %c0_17 = arith.constant 0 : index
    %27 = vector.load %arg6[%c0_16, %c0_17] : memref<128x64xf32, #tpu.memory_space<vmem>>, vector<128x64xf32>
    %cst_18 = arith.constant dense<0.000000e+00> : vector<16x64xf32>
    %28 = tpu.matmul %26, %27, %cst_18 {dimension_numbers = #tpu.dot_dimension_numbers<[1], [0], [0], [1], [0, 0, 1, 1], [], []>} : vector<16x128xf32>, vector<128x64xf32>, vector<16x64xf32> -> vector<16x64xf32>
    %c0_19 = arith.constant 0 : index
    %c0_20 = arith.constant 0 : index
    %29 = vector.load %arg7[%c0_19, %c0_20] : memref<1x64xf32, #tpu.memory_space<vmem>>, vector<1x64xf32>
    %30 = vector.broadcast %29 : vector<1x64xf32> to vector<16x64xf32>
    %31 = arith.addf %28, %30 : vector<16x64xf32>
    %c0_21 = arith.constant 0 : index
    %c0_22 = arith.constant 0 : index
    %32 = vector.load %arg8[%c0_21, %c0_22] : memref<16x64xf32, #tpu.memory_space<vmem>>, vector<16x64xf32>
    tpu.vector_store %arg8[%c0_21, %c0_22], %31 {strides = array<i32>} : memref<16x64xf32, #tpu.memory_space<vmem>>, vector<16x64xf32>,
    %33 = arith.mulf %0, %0 : vector<16x64xf32>
    %cst_23 = arith.constant dense<0.000000e+00> : vector<16xf32>
    %34 = vector.multi_reduction <add>, %33, %cst_23 [1] : vector<16x64xf32> to vector<16xf32>
    %35 = vector.shape_cast %34 : vector<16xf32> to vector<16x1xf32>
    %cst_24 = arith.constant 1.000000e-24 : f32
    %36 = vector.broadcast %cst_24 : f32 to vector<16x1xf32>
    %37 = arith.maximumf %35, %36 : vector<16x1xf32>
    %38 = math.rsqrt %37 : vector<16x1xf32>
    %39 = vector.broadcast %38 : vector<16x1xf32> to vector<16x64xf32>
    %40 = arith.mulf %0, %39 : vector<16x64xf32>
    %c0_25 = arith.constant 0 : index
    %c0_26 = arith.constant 0 : index
    %41 = vector.load %arg9[%c0_25, %c0_26] : memref<16x64xf32, #tpu.memory_space<vmem>>, vector<16x64xf32>
    tpu.vector_store %arg9[%c0_25, %c0_26], %40 {strides = array<i32>} : memref<16x64xf32, #tpu.memory_space<vmem>>, vector<16x64xf32>,
    return
  }
  func.func @transform_0(%arg0: i32) -> (i32, i32) {
    %c0_i32 = arith.constant 0 : i32
    %c0_i32_0 = arith.constant 0 : i32
    return %arg0, %c0_i32 : i32, i32
  }
  func.func @transform_1(%arg0: i32) -> (i32, i32) {
    %c0_i32 = arith.constant 0 : i32
    %c0_i32_0 = arith.constant 0 : i32
    %c0_i32_1 = arith.constant 0 : i32
    return %c0_i32, %c0_i32_0 : i32, i32
  }
  func.func @transform_2(%arg0: i32) -> (i32, i32) {
    %c0_i32 = arith.constant 0 : i32
    %c0_i32_0 = arith.constant 0 : i32
    %c0_i32_1 = arith.constant 0 : i32
    return %c0_i32, %c0_i32_0 : i32, i32
  }
  func.func @transform_3(%arg0: i32) -> (i32, i32) {
    %c0_i32 = arith.constant 0 : i32
    %c0_i32_0 = arith.constant 0 : i32
    %c0_i32_1 = arith.constant 0 : i32
    return %c0_i32, %c0_i32_0 : i32, i32
  }
  func.func @transform_4(%arg0: i32) -> (i32, i32) {
    %c0_i32 = arith.constant 0 : i32
    %c0_i32_0 = arith.constant 0 : i32
    %c0_i32_1 = arith.constant 0 : i32
    return %c0_i32, %c0_i32_0 : i32, i32
  }
  func.func @transform_5(%arg0: i32) -> (i32, i32) {
    %c0_i32 = arith.constant 0 : i32
    %c0_i32_0 = arith.constant 0 : i32
    %c0_i32_1 = arith.constant 0 : i32
    return %c0_i32, %c0_i32_0 : i32, i32
  }
  func.func @transform_6(%arg0: i32) -> (i32, i32) {
    %c0_i32 = arith.constant 0 : i32
    %c0_i32_0 = arith.constant 0 : i32
    %c0_i32_1 = arith.constant 0 : i32
    return %c0_i32, %c0_i32_0 : i32, i32
  }
  func.func @transform_7(%arg0: i32) -> (i32, i32) {
    %c0_i32 = arith.constant 0 : i32
    %c0_i32_0 = arith.constant 0 : i32
    return %arg0, %c0_i32 : i32, i32
  }
  func.func @transform_8(%arg0: i32) -> (i32, i32) {
    %c0_i32 = arith.constant 0 : i32
    %c0_i32_0 = arith.constant 0 : i32
    return %arg0, %c0_i32 : i32, i32
  }
}

</mosaic_0001>

<bundles_post_ra>
// kernel: tpu_custom_call.1
= control target key start
LH: loop header
LB: loop body
LE: loop exit
PB: predicated region body
PF: predicated region fallthrough
CT: control target
= control target key end

     0   :  { %14 = vsyncpa [#allocation3], 0  ;;  %s1563_s0 = inlined_call_operand.hbm [shape: f32[48,64], index: 0, kind: input, shape index: {}]   ;;  %s1564_s1 = inlined_call_operand.vmem [shape: f32[64,128], index: 1, kind: input, shape index: {}]   ;;  %s1565_s2 = inlined_call_operand.vmem [shape: f32[1,128], index: 2, kind: input, shape index: {}]   ;;  %s1566_s3 = inlined_call_operand.vmem [shape: f32[128,128], index: 3, kind: input, shape index: {}]   ;;  %s1567_s4 = inlined_call_operand.vmem [shape: f32[1,128], index: 4, kind: input, shape index: {}]   ;;  %s1568_s5 = inlined_call_operand.vmem [shape: f32[128,64], index: 5, kind: input, shape index: {}]   ;;  %s1569_s6 = inlined_call_operand.vmem [shape: f32[1,64], index: 6, kind: input, shape index: {}]   ;;  %s1570_s7 = inlined_call_operand.hbm [shape: f32[48,64], index: 7, kind: output, shape index: {0}]   ;;  %s1571_s8 = inlined_call_operand.hbm [shape: f32[48,64], index: 8, kind: output, shape index: {1}]  }
   0x1   :  { %16 = vsyncpa [#allocation3 + $0x1], 0 }
   0x2   :  { %17 = vsyncpa [#allocation4], 0 }
   0x3   :  { %19 = vsyncpa [#allocation4 + $0x1], 0 }
   0x4   :  { %20 = vsyncpa [#allocation7], 0 }
   0x5   :  { %22 = vsyncpa [#allocation7 + $0x1], 0  ;;  %s1215_s27 = smov 0   ;;  %s1217_s28 = smov 0  }
   0x6   :  { %s1219_s29 = smov 0   ;;  %s1221_s30 = smov 0  }
   0x7 LB: > { %s1236_s9 = sadd.s32 4294967295, %s1161_s30   ;;  %s811_s10 = sadd.s32 4294967294, %s1161_s30   ;;  %s1161_s30 = sphi %s1221_s30, %s1589_s30   ;;  %s1157_s29 = sphi %s1219_s29, %s1588_s29   ;;  %s1153_s28 = sphi %s1217_s28, %s1587_s28   ;;  %s1149_s27 = sphi %s1215_s27, %s1586_s27  }
   0x8   : > { %s1240_s11 = sadd.s32 1, %s1161_s30   ;;  %s35_s12 = sadd.s32 1, %s1157_s29 }
   0x9   : > { %s32_s13 = ssub.s32 %s1161_s30, %s1240_s11  ;;  %p42_p0 = scmp.ne.s32.totalorder %s1157_s29, %s1153_s28 }
   0xa   : > { %p33_p1 = scmp.eq.s32.totalorder %s32_s13, 0  ;;  %p43_p2 = scmp.eq.s32.totalorder %s1161_s30, 0 }
   0xb   : > { %p48_p3 = scmp.ne.s32.totalorder %s1153_s28, %s1149_s27  ;;  %p49_p4 = scmp.eq.s32.totalorder %s1236_s9, 0 }
   0xc   : > { %s1252_s14 = scalar_select %p33_p1, %s1157_s29, %s35_s12  }
   0xd   : > { %p1254_p5 = por %p43_p2, %p42_p0  ;;  %p1258_p6 = por %p49_p4, %p48_p3 }
   0xe   : > { %1575 = sst [smem:[#allocation11_spill]] %s1252_s14  ;;  %p198_p7 = scmp.eq.s32.totalorder %s1236_s9, 2 }
   0xf   : > { %s1577_s16 = scalar_select %p1258_p6, 1, 0 }
  0x10   : > { %p204_p8 = scmp.eq.s32.totalorder %s811_s10, 2  ;;  %p989_p9 = scmp.lt.s32.totalorder %s1161_s30, 3 }
  0x11   : > { %p1264_p10 = por %p198_p7, %p42_p0  ;;  %s268_s19 = sand.u32 1, %s1157_s29  }
  0x12   : > { %p1268_p11 = por %p204_p8, %p48_p3  ;;  %s834_s20 = sshll.u32 %s1161_s30, 8 }
  0x13   : > { %s1578_s17 = scalar_select %p1264_p10, 1, 0 }
  0x14   : > { %s1579_s18 = scalar_select %p1268_p11, 1, 0 }
  0x15   : > { %s814_s21 = sshll.u32 %s268_s19, 4  ;;  %s1277_s24 = scalar_lea.hbm %s1563_s0, %s834_s20 }
  0x16   : > { %s272_s25 = scalar_lea.vmem [#allocation2], %s814_s21  ;;  %p1281_p12 = pnand %p989_p9, %p1254_p5 }
  0x17   : > { %s279_s26 = sshll.u32 %s272_s25, 4  ;;  %s1287_s12 = scalar_lea.sflag [#allocation3], %s268_s19  ;;  %s1285_s26 = int_to_ptr.vmem [resolvable:$true] %s279_s26 }
  0x18   : > { %s1039_s13 = scalar_lea.hbm %s1277_s24, 256  ;;  %p1041_p0 = pneg %p1281_p12 }
  0x19   : > { %p1040_p13 = scmp.ne.s32.totalorder %s1277_s24, %s1039_s13  ;;  %s1044_s21 = scalar_lea.hbm %s1563_s0, 768 }
  0x1a   : > { %p1045_p3 = scmp.lt.s32.totalorder %s1277_s24, %s1563_s0  ;;  %p1046_p4 = scmp.lt.s32.totalorder %s1044_s21, %s1039_s13 }
  0x1b   : > { %p1042_p1 = pnand %p1041_p0, %p1040_p13 }
  0x1c   : > { %p1047_p5 = por %p1046_p4, %p1045_p3 }
  0x1d   : > { %p1043_p2 = pneg %p1042_p1 }
  0x1f   : > { %p1048_p7 = pnand %p1047_p5, %p1043_p2 }
  0x21   : > { %1051 = shalt.err (!%p1048_p7)
}
  0x22   : > { %s1052_s19 = scalar_lea.vmem %s1285_s26, 256  ;;  %s1163_s25 = smov [#allocation2]  }
  0x23   : > { %p1053_p8 = scmp.ne.s32.totalorder %s1285_s26, %s1052_s19  ;;  %s1057_s14 = sshll.u32 %s1163_s25, 4  ;;  %s1058_s14 = int_to_ptr.vmem [resolvable:$false] %s1057_s14 }
  0x24   : > { %s1059_s20 = scalar_lea.vmem %s1058_s14, 512  ;;  %p1060_p1 = scmp.lt.s32.totalorder %s1285_s26, %s1058_s14 }
  0x25   : > { %p1055_p9 = pnand %p1053_p8, %p1041_p0  ;;  %p1061_p11 = scmp.lt.s32.totalorder %s1059_s20, %s1052_s19 }
  0x27   : > { %p1056_p13 = pneg %p1055_p9  ;;  %p1062_p10 = por %p1061_p11, %p1060_p1 }
  0x29   : > { %p1063_p6 = pnand %p1062_p10, %p1056_p13 }
  0x2b   : > { %1066 = shalt.err (!%p1063_p6)
}
  0x2c   : > { %s1164_s13 = smov 128   ;;  %s1165_s22 = smov 8  }
  0x2d   : > { %981 = dma.hbm_to_vmem [thread:$0]  (!%p1281_p12), %s1277_s24, 256, %s1285_s26, %s1287_s12, %s1164_s13, %s1164_s13, %s1165_s22  }
  0x2e   : > { %p817_p0 = scmp.ge.s32.totalorder %s1161_s30, 1  ;;  %p287_p2 = scmp.lt.s32.totalorder %s1161_s30, 4 }
  0x30   : > { %p288_p3 = pnand %p817_p0, %p287_p2 }
  0x31   : > { %s1311_s14 = sand.u32 (!%p288_p3), 1, %s1153_s28   ;;  %p1581_p6 = scmp.ne.s32.totalorder (!%p288_p3), %s1577_s16, 0 }
  0x32   : > { %291 = sbr.rel (%p288_p3) target bundleno = 719 (0x2cf), region = 48  ;;  %s1314_s21 = sshll.u32 (!%p288_p3), %s1311_s14, 4 }
  0x33   : > { %s294_s15 = scalar_lea.sflag (!%p288_p3), [#allocation3], %s1311_s14  ;;  %s297_s23 = scalar_lea.vmem (!%p288_p3), [#allocation2], %s1314_s21 }
  0x37   : > { %1136 = dma.done.wait (%p1581_p6), %s294_s15, 256  }
  0x38   : > { %1138 = vsyncadd (%p1581_p6), %s294_s15, 4294967040  ;;  %v347_v0 = vld [vmem:[%s1564_s1 + $0x38] sm:$0xff]  ;;  %v346_v1 = vld [vmem:[%s1564_s1 + $0x30] sm:$0xff]  ;;  %vm355_vm0 = vcmask 523264   ;;  %s334_s10 = scalar_lea.vmem [#allocation6], %s1314_s21  ;;  %s1574_s12 = sshll.u32 %s1236_s9, 8 }
  0x39   : > { %883 = vmatprep.subr.mxu0 %v347_v0  ;;  %v345_v2 = vld [vmem:[%s1564_s1 + $0x28] sm:$0xff]  ;;  %v1333_v3 = vld [vmem:[%s297_s23] sm:$0xff]  ;;  %v462_v4 = vld [vmem:[%s1566_s3 + $0x78] sm:$0xff]  ;;  %s1477_s25 = scalar_lea.hbm %s1571_s8, %s1574_s12  ;;  %s706_s16 = sshll.u32 %s334_s10, 4  ;;  %s1479_s16 = int_to_ptr.vmem [resolvable:$true] %s706_s16 }
  0x3a   : > { %884 = vmatpush3.msra.mxu0 %v347_v0  ;;  %899 = vmatprep.mubr.msk.f32.mxu0 %vm355_vm0, %v1333_v3  ;;  %v461_v5 = vld [vmem:[%s1566_s3 + $0x70] sm:$0xff]  ;;  %v344_v6 = vld [vmem:[%s1564_s1 + $0x20] sm:$0xff]  ;;  %v460_v7 = vld [vmem:[%s1566_s3 + $0x68] sm:$0xff]  ;;  %v655_v57 = vmul.f32 %v1333_v3, %v1333_v3  ;;  %s677_s20 = scalar_lea.sflag [#allocation7], %s1311_s14  ;;  %s1067_s13 = scalar_lea.vmem %s1479_s16, 256 }
  0x3b   : > { %885 = vmatprep.subr.mxu0 %v346_v1  ;;  %902 = vmatprep.subr.mxu1 %v462_v4  ;;  %v343_v8 = vld [vmem:[%s1564_s1 + $0x18] sm:$0xff]  ;;  %v342_v9 = vld [vmem:[%s1564_s1 + $0x10] sm:$0xff]  ;;  %v341_v10 = vld [vmem:[%s1564_s1 + $0x8] sm:$0xff]  ;;  %p1068_p10 = scmp.ne.s32.totalorder %s1479_s16, %s1067_s13  ;;  %p1582_p11 = scmp.ne.s32.totalorder %s1578_s17, 0 }
  0x3c   : > { %886 = vmatpush3.msra.mxu0 %v346_v1  ;;  %903 = vmatpush3.msra.mxu1 %v462_v4  ;;  %v340_v11 = vld [vmem:[%s1564_s1] sm:$0xff]  ;;  %v1363_v12 = vld [vmem:[%s297_s23 + $0x8] sm:$0xff]  ;;  %v457_v15 = vld [vmem:[%s1566_s3 + $0x50] sm:$0xff]  ;;  %v657_v59 = vsel %vm355_vm0, %v655_v57, 0.0  ;;  %s1166_s22 = smov [#allocation6]  }
  0x3d   : > { %887 = vmatprep.subr.mxu0 %v345_v2  ;;  %904 = vmatprep.subr.mxu1 %v461_v5  ;;  %v459_v13 = vld [vmem:[%s1566_s3 + $0x60] sm:$0xff]  ;;  %v458_v14 = vld [vmem:[%s1566_s3 + $0x58] sm:$0xff]  ;;  %v456_v16 = vld [vmem:[%s1566_s3 + $0x48] sm:$0xff]  ;;  %v656_v58 = vmul.f32 %v1363_v12, %v1363_v12  ;;  %p1069_p12 = pnand %p1068_p10, %p1582_p11  ;;  %s1071_s15 = sshll.u32 %s1166_s22, 4  ;;  %s1072_s15 = int_to_ptr.vmem [resolvable:$false] %s1071_s15 }
  0x3e   : > { %888 = vmatpush3.msra.mxu0 %v345_v2  ;;  %905 = vmatpush3.msra.mxu1 %v461_v5  ;;  %v455_v17 = vld [vmem:[%s1566_s3 + $0x40] sm:$0xff]  ;;  %v454_v18 = vld [vmem:[%s1566_s3 + $0x38] sm:$0xff]  ;;  %v453_v19 = vld [vmem:[%s1566_s3 + $0x30] sm:$0xff]  ;;  %s1073_s24 = scalar_lea.vmem %s1072_s15, 512  ;;  %p1074_p5 = scmp.lt.s32.totalorder %s1479_s16, %s1072_s15 }
  0x3f   : > { %889 = vmatprep.subr.mxu0 %v344_v6  ;;  %906 = vmatprep.subr.mxu1 %v460_v7  ;;  %v452_v20 = vld [vmem:[%s1566_s3 + $0x28] sm:$0xff]  ;;  %v451_v21 = vld [vmem:[%s1566_s3 + $0x20] sm:$0xff]  ;;  %v450_v22 = vld [vmem:[%s1566_s3 + $0x18] sm:$0xff]  ;;  %v660_v60 = vsel %vm355_vm0, %v656_v58, 0.0  ;;  %p1070_p4 = pneg %p1069_p12  ;;  %p1075_p7 = scmp.lt.s32.totalorder %s1073_s24, %s1067_s13 }
  0x40   : > { %890 = vmatpush3.msra.mxu0 %v344_v6  ;;  %907 = vmatpush3.msra.mxu1 %v460_v7  ;;  %v449_v23 = vld [vmem:[%s1566_s3 + $0x10] sm:$0xff]  ;;  %v448_v24 = vld [vmem:[%s1566_s3 + $0x8] sm:$0xff]  ;;  %v447_v25 = vld [vmem:[%s1566_s3] sm:$0xff] }
  0x41   : > { %891 = vmatprep.subr.mxu0 %v343_v8  ;;  %908 = vmatprep.subr.mxu1 %v459_v13  ;;  %v570_v26 = vld [vmem:[%s1568_s5 + $0x78] sm:$0xff]  ;;  %v569_v27 = vld [vmem:[%s1568_s5 + $0x70] sm:$0xff]  ;;  %v568_v28 = vld [vmem:[%s1568_s5 + $0x68] sm:$0xff]  ;;  %p1076_p8 = por %p1075_p7, %p1074_p5 }
  0x42   : > { %892 = vmatpush3.msra.mxu0 %v343_v8  ;;  %909 = vmatpush3.msra.mxu1 %v459_v13  ;;  %v821_v29 = vld [vmem:[%s1565_s2] ss:$0 sm:$0xff]  ;;  %v566_v45 = vld [vmem:[%s1568_s5 + $0x58] sm:$0xff]  ;;  %v565_v46 = vld [vmem:[%s1568_s5 + $0x50] sm:$0xff] }
  0x43   : > { %893 = vmatprep.subr.mxu0 %v342_v9  ;;  %910 = vmatprep.subr.mxu1 %v458_v14  ;;  %v567_v44 = vld [vmem:[%s1568_s5 + $0x60] sm:$0xff]  ;;  %v564_v47 = vld [vmem:[%s1568_s5 + $0x48] sm:$0xff]  ;;  %v562_v49 = vld [vmem:[%s1568_s5 + $0x38] sm:$0xff]  ;;  %p1077_p9 = pnand %p1076_p8, %p1070_p4 }
  0x44   : > { %894 = vmatpush3.msra.mxu0 %v342_v9  ;;  %911 = vmatpush3.msra.mxu1 %v458_v14  ;;  %v563_v48 = vld [vmem:[%s1568_s5 + $0x40] sm:$0xff]  ;;  %v561_v50 = vld [vmem:[%s1568_s5 + $0x30] sm:$0xff]  ;;  %v560_v51 = vld [vmem:[%s1568_s5 + $0x28] sm:$0xff] }
  0x45   : > { %895 = vmatprep.subr.mxu0 %v341_v10  ;;  %912 = vmatprep.subr.mxu1 %v457_v15  ;;  %v559_v52 = vld [vmem:[%s1568_s5 + $0x20] sm:$0xff]  ;;  %v558_v53 = vld [vmem:[%s1568_s5 + $0x18] sm:$0xff]  ;;  %v557_v54 = vld [vmem:[%s1568_s5 + $0x10] sm:$0xff] }
  0x46   : > { %896 = vmatpush3.msra.mxu0 %v341_v10  ;;  %913 = vmatpush3.msra.mxu1 %v457_v15  ;;  %v556_v55 = vld [vmem:[%s1568_s5 + $0x8] sm:$0xff]  ;;  %v555_v56 = vld [vmem:[%s1568_s5] sm:$0xff] }
  0x47   : > { %897 = vmatprep.subr.mxu0 %v340_v11  ;;  %914 = vmatprep.subr.mxu1 %v456_v16  ;;  %v824_v61 = vld [vmem:[%s1567_s4] ss:$0 sm:$0xff] }
  0x48   : > { %898 = vmatpush3.msra.mxu0 %v340_v11  ;;  %915 = vmatpush3.msra.mxu1 %v456_v16 }
  0x49   : > { %900 = vmatmul.mubr.msk.f32.vlgmr.msra.gmra.mxu0 %vm355_vm0, %v1363_v12  ;;  %916 = vmatprep.subr.mxu1 %v455_v17 }
  0x4a   : > { %917 = vmatpush3.msra.mxu1 %v455_v17  ;;  %937 = vmatprep.subr.mxu0 %v570_v26 }
  0x4b   : > { %918 = vmatprep.subr.mxu1 %v454_v18  ;;  %938 = vmatpush3.msra.mxu0 %v570_v26 }
  0x4c   : > { %919 = vmatpush3.msra.mxu1 %v454_v18  ;;  %939 = vmatprep.subr.mxu0 %v569_v27 }
  0x4d   : > { %920 = vmatprep.subr.mxu1 %v453_v19  ;;  %940 = vmatpush3.msra.mxu0 %v569_v27 }
  0x4e   : > { %921 = vmatpush3.msra.mxu1 %v453_v19  ;;  %941 = vmatprep.subr.mxu0 %v568_v28 }
  0x4f   : > { %922 = vmatprep.subr.mxu1 %v452_v20  ;;  %942 = vmatpush3.msra.mxu0 %v568_v28 }
  0x50   : > { %923 = vmatpush3.msra.mxu1 %v452_v20  ;;  %943 = vmatprep.subr.mxu0 %v567_v44 }
  0x51   : > { %924 = vmatprep.subr.mxu1 %v451_v21  ;;  %944 = vmatpush3.msra.mxu0 %v567_v44 }
  0x52   : > { %925 = vmatpush3.msra.mxu1 %v451_v21  ;;  %945 = vmatprep.subr.mxu0 %v566_v45 }
  0x53   : > { %926 = vmatprep.subr.mxu1 %v450_v22  ;;  %946 = vmatpush3.msra.mxu0 %v566_v45 }
  0x54   : > { %927 = vmatpush3.msra.mxu1 %v450_v22  ;;  %947 = vmatprep.subr.mxu0 %v565_v46 }
  0x55   : > { %928 = vmatprep.subr.mxu1 %v449_v23  ;;  %948 = vmatpush3.msra.mxu0 %v565_v46 }
  0x56   : > { %929 = vmatpush3.msra.mxu1 %v449_v23  ;;  %949 = vmatprep.subr.mxu0 %v564_v47 }
  0x57   : > { %930 = vmatprep.subr.mxu1 %v448_v24  ;;  %950 = vmatpush3.msra.mxu0 %v564_v47 }
  0x58   : > { %931 = vmatpush3.msra.mxu1 %v448_v24  ;;  %951 = vmatprep.subr.mxu0 %v563_v48 }
  0x59   : > { %932 = vmatprep.subr.mxu1 %v447_v25  ;;  %952 = vmatpush3.msra.mxu0 %v563_v48 }
  0x5a   : > { %933 = vmatpush3.msra.mxu1 %v447_v25  ;;  %953 = vmatprep.subr.mxu0 %v562_v49 }
  0x5b   : > { %954 = vmatpush3.msra.mxu0 %v562_v49  ;;  %658 = vadd.xlane.f32.xlu0 %v657_v59 }
  0x5c   : > { %955 = vmatprep.subr.mxu0 %v561_v50 }
  0x5d   : > { %956 = vmatpush3.msra.mxu0 %v561_v50 }
  0x5e   : > { %957 = vmatprep.subr.mxu0 %v560_v51 }
  0x5f   : > { %958 = vmatpush3.msra.mxu0 %v560_v51  ;;  %661 = vadd.xlane.f32.xlu0 %v660_v60 }
  0x60   : > { %959 = vmatprep.subr.mxu0 %v559_v52 }
  0x61   : > { %960 = vmatpush3.msra.mxu0 %v559_v52 }
  0x62   : > { %961 = vmatprep.subr.mxu0 %v558_v53 }
  0x63   : > { %962 = vmatpush3.msra.mxu0 %v558_v53 }
  0x64   : > { %963 = vmatprep.subr.mxu0 %v557_v54 }
  0x65   : > { %964 = vmatpush3.msra.mxu0 %v557_v54 }
  0x66   : > { %965 = vmatprep.subr.mxu0 %v556_v55 }
  0x67   : > { %966 = vmatpush3.msra.mxu0 %v556_v55 }
  0x68   : > { %967 = vmatprep.subr.mxu0 %v555_v56 }
  0x69   : > { %968 = vmatpush3.msra.mxu0 %v555_v56 }
  0xe4   : > { %v659_v14 = vpop.xlane.xlu0 %658 }
  0xe5   : > { %v663_v16 = vmax.f32 %v659_v14, 1e-24 }
  0xe8   : > { %v662_v15 = vpop.xlane.xlu0 %661 }
  0xe9   : > { %v664_v17 = vmax.f32 %v662_v15, 1e-24 }
 0x109   : > { %v901_v30 = vpop.f32.mrf.mxu0 }
 0x10a   : > { %v434_v31 = vadd.f32 %v901_v30, %v821_v29 }
 0x10b   : > { %v428_v32 = vpop.f32.mrf.mxu0 }
 0x10c   : > { %v440_v33 = vmul.f32 0.70710677, %v434_v31  ;;  %v429_v34 = vadd.f32 %v821_v29, %v428_v32  ;;  %v438_v41 = vmul.f32 0.5, %v434_v31 }
 0x10e   : > { %1027 = verf.f32 %v440_v33  ;;  %v439_v35 = vmul.f32 0.70710677, %v429_v34  ;;  %v437_v39 = vmul.f32 0.5, %v429_v34 }
 0x110   : > { %1029 = verf.f32 %v439_v35 }
 0x11b   : > { %v1028_v36 = vpop.eup %1027 }
 0x11c   : > { %v444_v38 = vadd.f32 1.0, %v1028_v36 }
 0x11d   : > { %v1030_v37 = vpop.eup %1029 }
 0x11e   : > { %v443_v40 = vadd.f32 1.0, %v1030_v37  ;;  %v446_v43 = vmul.f32 %v444_v38, %v438_v41 }
 0x120   : > { %v445_v42 = vmul.f32 %v443_v40, %v437_v39 }
 0x122   : > { %934 = vmatprep.mubr.f32.mxu1 %v445_v42 }
 0x123   : > { %935 = vmatmul.mubr.f32.vlgmr.msra.gmra.mxu1 %v446_v43 }
 0x1e3   : > { %v936_v62 = vpop.f32.mrf.mxu1 }
 0x1e4   : > { %v542_v63 = vadd.f32 %v936_v62, %v824_v61 }
 0x1e5   : > { %v536_v0 = vpop.f32.mrf.mxu1 }
 0x1e6   : > { %v548_v1 = vmul.f32 0.70710677, %v542_v63  ;;  %v537_v2 = vadd.f32 %v824_v61, %v536_v0  ;;  %v546_v10 = vmul.f32 0.5, %v542_v63 }
 0x1e8   : > { %1031 = verf.f32 %v548_v1  ;;  %v547_v4 = vmul.f32 0.70710677, %v537_v2  ;;  %v545_v8 = vmul.f32 0.5, %v537_v2 }
 0x1ea   : > { %1033 = verf.f32 %v547_v4 }
 0x1eb   : > { %1035 = vrsqrt.f32 %v663_v16 }
 0x1ec   : > { %1037 = vrsqrt.f32 %v664_v17 }
 0x1f5   : > { %v1032_v5 = vpop.eup %1031 }
 0x1f6   : > { %v552_v7 = vadd.f32 1.0, %v1032_v5 }
 0x1f7   : > { %v1034_v6 = vpop.eup %1033 }
 0x1f8   : > { %v551_v9 = vadd.f32 1.0, %v1034_v6  ;;  %v554_v13 = vmul.f32 %v552_v7, %v546_v10  ;;  %v1036_v18 = vpop.eup %1035 }
 0x1f9   : > { %v1038_v19 = vpop.eup %1037  ;;  %v667_v20 = vmul.f32 %v1036_v18, %v1333_v3 }
 0x1fa   : > { %v553_v11 = vmul.f32 %v551_v9, %v545_v8  ;;  %v668_v21 = vmul.f32 %v1038_v19, %v1363_v12 }
 0x1fb   : > { %669 = vst.msk [vmem:[%s334_s10] sm:$0xff] %vm355_vm0, %v667_v20 }
 0x1fc   : > { %969 = vmatprep.mubr.f32.mxu0 %v553_v11  ;;  %670 = vst.msk [vmem:[%s334_s10 + $0x8] sm:$0xff] %vm355_vm0, %v668_v21 }
 0x1fd   : > { %970 = vmatmul.mubr.f32.vlgmr.msra.gmra.mxu0 %v554_v13 }
 0x1fe   : > { %1080 = shalt.err (!%p1077_p9)
}
 0x1ff   : > { %s1081_s26 = scalar_lea.hbm %s1477_s25, 256  ;;  %s1085_s23 = scalar_lea.hbm %s1571_s8, 768 }
 0x200   : > { %p1082_p13 = scmp.ne.s32.totalorder %s1477_s25, %s1081_s26  ;;  %p1086_p2 = scmp.lt.s32.totalorder %s1477_s25, %s1571_s8 }
 0x201   : > { %p1087_p3 = scmp.lt.s32.totalorder %s1085_s23, %s1081_s26 }
 0x202   : > { %p1083_p1 = pnand %p1082_p13, %p1582_p11 }
 0x203   : > { %p1088_p6 = por %p1087_p3, %p1086_p2 }
 0x204   : > { %p1084_p0 = pneg %p1083_p1 }
 0x206   : > { %p1089_p10 = pnand %p1088_p6, %p1084_p0 }
 0x208   : > { %1092 = shalt.err (!%p1089_p10)
}
 0x209   : > { %s1167_s13 = smov 128   ;;  %s1168_s15 = smov 8   ;;  %v825_v3 = vld [vmem:[%s1569_s6] ss:$0 sm:$0xff] }
 0x20a   : > { %975 = dma.vmem_to_hbm [thread:$0]  (%p1582_p11), %s1479_s16, 256, %s1477_s25, %s677_s20, %s1167_s13, %s1167_s13, %s1168_s15  }
 0x20b   : > { %s327_s26 = scalar_lea.vmem [#allocation5], %s1314_s21  ;;  %s1583_s19 = sshll.u32 %s1236_s9, 8 }
 0x20c   : > { %s690_s10 = sshll.u32 %s327_s26, 4  ;;  %s1519_s16 = scalar_lea.hbm %s1570_s7, %s1583_s19  ;;  %s1511_s10 = int_to_ptr.vmem [resolvable:$true] %s690_s10 }
 0x20d   : > { %s672_s21 = scalar_lea.sflag [#allocation4], %s1311_s14  ;;  %s1093_s20 = scalar_lea.vmem %s1511_s10, 256 }
 0x20e   : > { %p1094_p12 = scmp.ne.s32.totalorder %s1511_s10, %s1093_s20  ;;  %s1169_s22 = smov [#allocation5]  }
 0x20f   : > { %s1097_s12 = sshll.u32 %s1169_s22, 4  ;;  %s1098_s12 = int_to_ptr.vmem [resolvable:$false] %s1097_s12 }
 0x210   : > { %p1095_p4 = pnand %p1094_p12, %p1582_p11  ;;  %s1099_s24 = scalar_lea.vmem %s1098_s12, 512 }
 0x211   : > { %p1100_p7 = scmp.lt.s32.totalorder %s1511_s10, %s1098_s12  ;;  %p1101_p8 = scmp.lt.s32.totalorder %s1099_s24, %s1093_s20 }
 0x212   : > { %p1096_p5 = pneg %p1095_p4 }
 0x213   : > { %p1102_p9 = por %p1101_p8, %p1100_p7 }
 0x215   : > { %p1103_p13 = pnand %p1102_p9, %p1096_p5 }
 0x2bd   : > { %v971_v12 = vpop.f32.mrf.mxu0 }
 0x2be   : > { %v650_v22 = vadd.f32 %v971_v12, %v825_v3 }
 0x2bf   : > { %v644_v23 = vpop.f32.mrf.mxu0 }
 0x2c0   : > { %654 = vst.msk [vmem:[%s327_s26 + $0x8] sm:$0xff] %vm355_vm0, %v650_v22  ;;  %v645_v24 = vadd.f32 %v825_v3, %v644_v23 }
 0x2c2   : > { %653 = vst.msk [vmem:[%s327_s26] sm:$0xff] %vm355_vm0, %v645_v24 }
 0x2c3   : > { %1106 = shalt.err (!%p1103_p13)
}
 0x2c4   : > { %s1107_s9 = scalar_lea.hbm %s1519_s16, 256  ;;  %s1111_s19 = scalar_lea.hbm %s1570_s7, 768 }
 0x2c5   : > { %p1108_p1 = scmp.ne.s32.totalorder %s1519_s16, %s1107_s9  ;;  %p1112_p3 = scmp.lt.s32.totalorder %s1519_s16, %s1570_s7 }
 0x2c6   : > { %p1113_p6 = scmp.lt.s32.totalorder %s1111_s19, %s1107_s9 }
 0x2c7   : > { %p1109_p0 = pnand %p1108_p1, %p1582_p11 }
 0x2c8   : > { %p1114_p10 = por %p1113_p6, %p1112_p3 }
 0x2c9   : > { %p1110_p2 = pneg %p1109_p0 }
 0x2cb   : > { %p1115_p12 = pnand %p1114_p10, %p1110_p2 }
 0x2cd   : > { %1118 = shalt.err (!%p1115_p12)
}
 0x2ce   : > { %974 = dma.vmem_to_hbm [thread:$0]  (%p1582_p11), %s1511_s10, 256, %s1519_s16, %s672_s21, %s1167_s13, %s1167_s13, %s1168_s15  }
 0x2cf PF: > { %p990_p4 = scmp.ge.s32.totalorder %s1161_s30, 2  ;;  %s721_s20 = sand.u32 1, %s1149_s27  }
 0x2d0   : > { %p1584_p5 = scmp.ne.s32.totalorder %s1579_s18, 0  ;;  %s722_s22 = scalar_lea.sflag [#allocation4], %s721_s20 }
 0x2d2   : > { %p983_p7 = pnand %p990_p4, %p1584_p5 }
 0x2d4   : > { %p984_p8 = pneg %p983_p7 }
 0x2d6   : > { %1140 = dma.done.wait (%p984_p8), %s722_s22, 256  }
 0x2d7   : > { %1142 = vsyncadd (%p984_p8), %s722_s22, 4294967040  ;;  %s731_s12 = scalar_lea.sflag [#allocation7], %s721_s20 }
 0x2d8   : > { %1144 = dma.done.wait (%p984_p8), %s731_s12, 256  }
 0x2d9   : > { %1146 = vsyncadd (%p984_p8), %s731_s12, 4294967040  ;;  %s1585_s17 = sld [smem:[#allocation11_spill]]  ;;  %p25_p11 = scmp.ge.s32.totalorder %s1240_s11, 5  }
 0x2da   : > { %s1586_s27 = smov %s1153_s28  ;;  %s1587_s28 = smov %s1157_s29 }
 0x2db   : > { %s1589_s30 = smov %s1240_s11  ;;  %27 = sbr.rel (!%p25_p11) target bundleno = 7 (0x7), region = 110 }
 0x2df   : > { %s1588_s29 = smov %s1585_s17 }
 0x2e0   :  { %736 = vsyncpa [#allocation3], 1 }
 0x2e1   :  { %738 = vsyncpa [#allocation3 + $0x1], 1 }
 0x2e2   :  { %739 = vsyncpa [#allocation4], 1 }
 0x2e3   :  { %741 = vsyncpa [#allocation4 + $0x1], 1 }
 0x2e4   :  { %742 = vsyncpa [#allocation7], 1 }
 0x2e5   :  { %744 = vsyncpa [#allocation7 + $0x1], 1 }

</bundles_post_ra>
